<compile_context>
chip_gen: v6e
topology: v6e:2x2x1
jax: 0.10.0
libtpu: 0.0.40
codegen_flags: <defaults>
</compile_context>

<pallas_src>
import functools

import jax
import jax.numpy as jnp
from jax import lax
from jax.experimental import pallas as pl
from jax.experimental.pallas import tpu as pltpu


def _full_attention_kernel(x_ref, wq_ref, wkv_ref, out_ref, metric_ref,
                           kv_ref, o_ref, macc_ref, *,
                           seq_len, feature_dim, num_heads, q_tile):
    """Grid = (batch, q_tile). One grid step handles all heads for one query tile."""
    S, F, H, tq = seq_len, feature_dim, num_heads, q_tile
    D = F // H
    qi = pl.program_id(1)

    # ---- Once per batch (q-tile axis is the inner, sequential axis): project K and V per
    # head into the persistent scratch (bounded (S, 2D) f32 temporaries) and accumulate the
    # head-mean metric in f32.
    @pl.when(qi == 0)
    def _():
        x = x_ref[0]                                                    # (S, F) bf16
        macc_ref[...] = jnp.zeros_like(macc_ref)

        def proj_body(h, carry):
            kv_h = jnp.dot(x, wkv_ref[h],
                           preferred_element_type=jnp.float32)         # (S, 2D) f32
            kv_b = kv_h.astype(jnp.bfloat16)                           # autocast round-trip
            kv_ref[h] = kv_b                                           # cache [K_h | V_h]
            macc_ref[...] += kv_b[:, 0:D].astype(jnp.float32)          # metric accumulator
            return carry

        lax.fori_loop(0, H, proj_body, 0)
        metric_ref[0] = (macc_ref[...] * (1.0 / H)).astype(metric_ref.dtype)

    # ---- Attention for this query tile, looped over heads (fori bounds live ranges).
    q0 = pl.multiple_of(qi * tq, tq)
    x_tile = x_ref[0, pl.ds(q0, tq), :]                                 # (tq, F) bf16

    def head_body(h, carry):
        # Q projection for this tile/head (1/sqrt(D) folded into wq on the host).
        q_h = jnp.dot(x_tile, wq_ref[h],
                      preferred_element_type=jnp.float32).astype(jnp.bfloat16)   # (tq, D)
        k_h = kv_ref[h, :, 0:D]                                          # (S, D) bf16
        v_h = kv_ref[h, :, D:2 * D]                                      # (S, D) bf16

        # scores = q @ k^T without materializing a transposed k tile.
        s = lax.dot_general(q_h, k_h,
                            dimension_numbers=(((1,), (1,)), ((), ())),
                            preferred_element_type=jnp.float32)          # (tq, S) f32
        m = jnp.max(s, axis=-1, keepdims=True)
        # TODO(synk): use bf16 exp on v6e/v7x (gen-gated) and fold the row-sum into the PV
        # matmul via an appended ones column when the loop is XLU/EUP-bound.
        p = jnp.exp(s - m)
        l = jnp.sum(p, axis=-1, keepdims=True)                           # (tq, 1)
        o = jnp.dot(p.astype(jnp.bfloat16), v_h,
                    preferred_element_type=jnp.float32)                  # (tq, D) f32
        o_ref[h] = (o * pl.reciprocal(l, approx=True)).astype(o_ref.dtype)
        return carry

    lax.fori_loop(0, H, head_body, 0, unroll=2)

    # Lane-dense assembly of the (1, tq, F) output block (static per-head column copies).
    for h in range(H):
        out_ref[0, :, h * D:(h + 1) * D] = o_ref[h]


def _pick_q_tile(S, budget):
    """Largest multiple-of-8 divisor of S that is <= budget, else S (full-S fallback)."""
    if S <= budget:
        return S
    cand = (budget // 8) * 8
    while cand >= 8:
        if S % cand == 0:
            return cand
        cand -= 8
    # TODO(synk): masked-tail / online-softmax path instead of the full-S fallback.
    return S


def full_attention(x, w_query, w_key, w_value, num_heads, *, q_tile=None):
    """x: (B, S, F).  w_*: (F_out, F_in) PyTorch Linear weights (no bias).

    Returns (output (B, S, F) bf16, metric (B, S, D) bf16).
    """
    B, S, F = x.shape
    assert F % num_heads == 0, "feature_dim must be divisible by num_heads"
    H = num_heads
    D = F // H
    scale = float(D) ** -0.5

    # Generation-aware VMEM budget: v5e/v6e have 128 MiB physical (use ~96 MiB, tq=512),
    # v7x has 64 MiB (use 48 MiB, tq=256).
    try:
        vmem_cap = int(pltpu.get_tpu_info().vmem_capacity_bytes)
    except Exception:   # conservative fallback if the query is unavailable
        vmem_cap = 64 * 1024 * 1024
    vmem_limit = min((vmem_cap * 3) // 4, 100 * 1024 * 1024)
    if q_tile is None:
        q_tile = 512 if vmem_cap >= 100 * 1024 * 1024 else 256

    tq = _pick_q_tile(S, q_tile)
    nq = S // tq

    # autocast: bf16 activations and weights.
    xb = x.astype(jnp.bfloat16)

    # Per-head weight layout. PyTorch Linear: y = x @ w.T, so output feature f is column f of
    # w.T and head h owns columns h*D:(h+1)*D.
    wq = jnp.transpose((w_query.T * scale).reshape(F, H, D),
                       (1, 0, 2)).astype(jnp.bfloat16)                    # (H, F, D)
    wk = w_key.T.reshape(F, H, D)
    wv = w_value.T.reshape(F, H, D)
    wkv = jnp.transpose(jnp.concatenate([wk, wv], axis=-1),
                        (1, 0, 2)).astype(jnp.bfloat16)                   # (H, F, 2D)

    kernel = functools.partial(_full_attention_kernel, seq_len=S, feature_dim=F,
                               num_heads=H, q_tile=tq)

    cost = pl.CostEstimate(
        flops=2 * B * S * F * 3 * F + 4 * B * H * S * S * D,
        transcendentals=B * H * S * S,
        bytes_accessed=2 * (2 * B * S * F + 3 * F * F + B * S * D))

    out, metric = pl.pallas_call(
        kernel,
        out_shape=(
            jax.ShapeDtypeStruct((B, S, F), jnp.bfloat16),
            jax.ShapeDtypeStruct((B, S, D), jnp.bfloat16),
        ),
        grid_spec=pltpu.PrefetchScalarGridSpec(
            num_scalar_prefetch=0,
            grid=(B, nq),
            in_specs=[
                # x: one (S, F) slab per batch, resident across the q-tile axis.
                pl.BlockSpec((1, S, F), lambda b, q: (b, 0, 0)),
                # per-head Q weights: constant index -> single-buffered.
                pl.BlockSpec((H, F, D), lambda b, q: (0, 0, 0),
                             pipeline_mode=pl.Buffered(1)),
                # per-head fused [K|V] weights: constant index -> single-buffered.
                pl.BlockSpec((H, F, 2 * D), lambda b, q: (0, 0, 0),
                             pipeline_mode=pl.Buffered(1)),
            ],
            out_specs=[
                # lane-dense (tq, F) output slab, written directly as (B, S, F).
                pl.BlockSpec((1, tq, F), lambda b, q: (b, q, 0)),
                # metric: written once per batch (q == 0), resident across q tiles.
                pl.BlockSpec((1, S, D), lambda b, q: (b, 0, 0)),
            ],
            scratch_shapes=[
                pltpu.VMEM((H, S, 2 * D), jnp.bfloat16),   # cached [K_h | V_h] per batch
                pltpu.VMEM((H, tq, D), jnp.bfloat16),      # per-head output staging
                pltpu.VMEM((S, D), jnp.float32),           # f32 metric accumulator
            ],
        ),
        compiler_params=pltpu.CompilerParams(
            # batch: megacore-parallel; q tiles: sequential (they reuse the per-batch K/V
            # scratch computed at q == 0 and share the resident metric block).
            dimension_semantics=("parallel", "arbitrary"),
            vmem_limit_bytes=int(vmem_limit)),
        cost_estimate=cost,
    )(xb, wq, wkv)
    return out, metric


def _reference(x, w_query, w_key, w_value, num_heads):
    """Pure-JAX f32 reference of the PyTorch forward (for sanity checking)."""
    B, S, F = x.shape
    D = F // num_heads
    scale = float(D) ** -0.5

    def proj(w):
        y = x @ w.T                                       # (B, S, F)
        return jnp.transpose(y.reshape(B, S, num_heads, D), (0, 2, 1, 3))

    q, k, v = proj(w_query), proj(w_key), proj(w_value)
    s = jnp.einsum("bhqd,bhkd->bhqk", q, k) * scale
    p = jax.nn.softmax(s, axis=-1)
    o = jnp.einsum("bhqk,bhkd->bhqd", p, v)
    out = jnp.transpose(o, (0, 2, 1, 3)).reshape(B, S, F)
    metric = k.mean(axis=1)
    return out, metric


if __name__ == "__main__":
    B, S, F, H = 2, 8, 32, 2   # head_dim D = 16
    key = jax.random.PRNGKey(0)
    kx, kq, kk, kv = jax.random.split(key, 4)

    x = jax.random.normal(kx, (B, S, F), dtype=jnp.float32)
    # Deterministic Linear weights (PyTorch Linear weight shape = (out_features, in_features)).
    bound = 1.0 / (F ** 0.5)
    w_query = jax.random.uniform(kq, (F, F), jnp.float32, -bound, bound)
    w_key = jax.random.uniform(kk, (F, F), jnp.float32, -bound, bound)
    w_value = jax.random.uniform(kv, (F, F), jnp.float32, -bound, bound)

    out, metric = jax.jit(functools.partial(full_attention, num_heads=H))(
        x, w_query, w_key, w_value)
    jax.block_until_ready((out, metric))

    ref_out, ref_metric = _reference(x, w_query, w_key, w_value, H)

    assert out.shape == (B, S, F) and out.dtype == jnp.bfloat16
    assert metric.shape == (B, S, F // H) and metric.dtype == jnp.bfloat16
    # bf16 compute (+ approx reciprocal) vs f32 reference -> loose tolerance.
    assert jnp.allclose(out.astype(jnp.float32), ref_out, atol=5e-2, rtol=5e-2)
    assert jnp.allclose(metric.astype(jnp.float32), ref_metric, atol=5e-2, rtol=5e-2)

    print("KERNEL_OK")
</pallas_src>

<mosaic_0001>
module attributes {stable_mosaic.version = 11 : i64} {
  func.func @_full_attention_kernel(%arg0: i32, %arg1: i32, %arg2: memref<1x8x32xbf16, #tpu.memory_space<vmem>>, %arg3: memref<2x32x16xbf16, #tpu.memory_space<vmem>>, %arg4: memref<2x32x32xbf16, #tpu.memory_space<vmem>>, %arg5: memref<1x8x32xbf16, #tpu.memory_space<vmem>>, %arg6: memref<1x8x16xbf16, #tpu.memory_space<vmem>>, %arg7: memref<2x8x32xbf16, #tpu.memory_space<vmem>>, %arg8: memref<2x8x16xbf16, #tpu.memory_space<vmem>>, %arg9: memref<8x16xf32, #tpu.memory_space<vmem>>) attributes {dimension_semantics = [#tpu.dimension_semantics<parallel>, #tpu.dimension_semantics<arbitrary>], iteration_bounds = array<i64: 2, 1>, scalar_prefetch = 0 : i64, scratch_operands = 3 : i64, tpu.core_type = #tpu.core_type<tc>, window_params = [{transform_indices = @transform_0, window_bounds = array<i64: 1, 8, 32>}, {pipeline_mode = #tpu.pipeline_mode<synchronous>, transform_indices = @transform_1, window_bounds = array<i64: 2, 32, 16>}, {pipeline_mode = #tpu.pipeline_mode<synchronous>, transform_indices = @transform_2, window_bounds = array<i64: 2, 32, 32>}, {transform_indices = @transform_3, window_bounds = array<i64: 1, 8, 32>}, {transform_indices = @transform_4, window_bounds = array<i64: 1, 8, 16>}]} {
    %c0_i32 = arith.constant 0 : i32
    %0 = arith.cmpi eq, %arg1, %c0_i32 : i32
    %1 = arith.extui %0 : i1 to i32
    %c0_i32_0 = arith.constant 0 : i32
    %2 = arith.cmpi ne, %1, %c0_i32_0 : i32
    scf.if %2 {
      %c0_38 = arith.constant 0 : index
      %c0_39 = arith.constant 0 : index
      %c0_40 = arith.constant 0 : index
      %76 = vector.load %arg2[%c0_38, %c0_39, %c0_40] : memref<1x8x32xbf16, #tpu.memory_space<vmem>>, vector<1x8x32xbf16>
      %77 = vector.shape_cast %76 : vector<1x8x32xbf16> to vector<8x32xbf16>
      %cst_41 = arith.constant 0.000000e+00 : f32
      %78 = vector.broadcast %cst_41 : f32 to vector<8x16xf32>
      %c0_42 = arith.constant 0 : index
      %c0_43 = arith.constant 0 : index
      %79 = vector.load %arg9[%c0_42, %c0_43] : memref<8x16xf32, #tpu.memory_space<vmem>>, vector<8x16xf32>
      tpu.vector_store %arg9[%c0_42, %c0_43], %78 {strides = array<i32>} : memref<8x16xf32, #tpu.memory_space<vmem>>, vector<8x16xf32>,
      %c0_i32_44 = arith.constant 0 : i32
      %c2_i32_45 = arith.constant 2 : i32
      %80 = arith.addi %c0_i32_44, %c2_i32_45 : i32
      %c1_i32_46 = arith.constant 1 : i32
      scf.for %arg10 = %c0_i32_44 to %80 step %c1_i32_46  : i32 {
        %88 = arith.index_cast %arg10 : i32 to index
        %c0_54 = arith.constant 0 : index
        %c0_55 = arith.constant 0 : index
        %89 = vector.load %arg4[%88, %c0_54, %c0_55] : memref<2x32x32xbf16, #tpu.memory_space<vmem>>, vector<1x32x32xbf16>
        %90 = vector.shape_cast %89 : vector<1x32x32xbf16> to vector<32x32xbf16>
        %cst_56 = arith.constant dense<0.000000e+00> : vector<8x32xf32>
        %91 = tpu.matmul %77, %90, %cst_56 {dimension_numbers = #tpu.dot_dimension_numbers<[1], [0], [0], [1], [0, 0, 1, 1], [], []>} : vector<8x32xbf16>, vector<32x32xbf16>, vector<8x32xf32> -> vector<8x32xf32>
        %92 = arith.truncf %91 : vector<8x32xf32> to vector<8x32xbf16>
        %93 = arith.index_cast %arg10 : i32 to index
        %c0_57 = arith.constant 0 : index
        %c0_58 = arith.constant 0 : index
        %94 = vector.load %arg7[%93, %c0_57, %c0_58] : memref<2x8x32xbf16, #tpu.memory_space<vmem>>, vector<1x8x32xbf16>
        %95 = vector.shape_cast %94 : vector<1x8x32xbf16> to vector<8x32xbf16>
        %96 = vector.shape_cast %92 : vector<8x32xbf16> to vector<1x8x32xbf16>
        tpu.vector_store %arg7[%93, %c0_57, %c0_58], %96 {strides = array<i32>} : memref<2x8x32xbf16, #tpu.memory_space<vmem>>, vector<1x8x32xbf16>,
        %c0_59 = arith.constant 0 : index
        %c0_60 = arith.constant 0 : index
        %97 = vector.load %arg9[%c0_59, %c0_60] : memref<8x16xf32, #tpu.memory_space<vmem>>, vector<8x16xf32>
        %98 = vector.extract_strided_slice %92 {offsets = [0, 0], sizes = [8, 16], strides = [1, 1]} : vector<8x32xbf16> to vector<8x16xbf16>
        %99 = arith.extf %98 : vector<8x16xbf16> to vector<8x16xf32>
        %100 = arith.addf %97, %99 : vector<8x16xf32>
        %c0_61 = arith.constant 0 : index
        %c0_62 = arith.constant 0 : index
        %101 = vector.load %arg9[%c0_61, %c0_62] : memref<8x16xf32, #tpu.memory_space<vmem>>, vector<8x16xf32>
        tpu.vector_store %arg9[%c0_61, %c0_62], %100 {strides = array<i32>} : memref<8x16xf32, #tpu.memory_space<vmem>>, vector<8x16xf32>,
      }
      %c2_i32_47 = arith.constant 2 : i32
      %c0_48 = arith.constant 0 : index
      %c0_49 = arith.constant 0 : index
      %81 = vector.load %arg9[%c0_48, %c0_49] : memref<8x16xf32, #tpu.memory_space<vmem>>, vector<8x16xf32>
      %cst_50 = arith.constant 5.000000e-01 : f32
      %82 = vector.broadcast %cst_50 : f32 to vector<8x16xf32>
      %83 = arith.mulf %81, %82 : vector<8x16xf32>
      %84 = arith.truncf %83 : vector<8x16xf32> to vector<8x16xbf16>
      %c0_51 = arith.constant 0 : index
      %c0_52 = arith.constant 0 : index
      %c0_53 = arith.constant 0 : index
      %85 = vector.load %arg6[%c0_51, %c0_52, %c0_53] : memref<1x8x16xbf16, #tpu.memory_space<vmem>>, vector<1x8x16xbf16>
      %86 = vector.shape_cast %85 : vector<1x8x16xbf16> to vector<8x16xbf16>
      %87 = vector.shape_cast %84 : vector<8x16xbf16> to vector<1x8x16xbf16>
      tpu.vector_store %arg6[%c0_51, %c0_52, %c0_53], %87 {strides = array<i32>} : memref<1x8x16xbf16, #tpu.memory_space<vmem>>, vector<1x8x16xbf16>,
    } else {
    }
    %c8_i32 = arith.constant 8 : i32
    %3 = arith.muli %arg1, %c8_i32 : i32
    %4 = tpu.assume_multiple %3, 8 : i32
    %c0 = arith.constant 0 : index
    %5 = arith.index_cast %4 : i32 to index
    %c0_1 = arith.constant 0 : index
    %6 = vector.load %arg2[%c0, %5, %c0_1] : memref<1x8x32xbf16, #tpu.memory_space<vmem>>, vector<1x8x32xbf16>
    %7 = vector.shape_cast %6 : vector<1x8x32xbf16> to vector<8x32xbf16>
    %c0_i32_2 = arith.constant 0 : i32
    %8 = arith.index_cast %c0_i32_2 : i32 to index
    %c0_3 = arith.constant 0 : index
    %c0_4 = arith.constant 0 : index
    %9 = vector.load %arg3[%8, %c0_3, %c0_4] : memref<2x32x16xbf16, #tpu.memory_space<vmem>>, vector<1x32x16xbf16>
    %10 = vector.shape_cast %9 : vector<1x32x16xbf16> to vector<32x16xbf16>
    %cst = arith.constant dense<0.000000e+00> : vector<8x16xf32>
    %11 = tpu.matmul %7, %10, %cst {dimension_numbers = #tpu.dot_dimension_numbers<[1], [0], [0], [1], [0, 0, 1, 1], [], []>} : vector<8x32xbf16>, vector<32x16xbf16>, vector<8x16xf32> -> vector<8x16xf32>
    %12 = arith.truncf %11 : vector<8x16xf32> to vector<8x16xbf16>
    %13 = arith.index_cast %c0_i32_2 : i32 to index
    %c0_5 = arith.constant 0 : index
    %c0_6 = arith.constant 0 : index
    %14 = vector.load %arg7[%13, %c0_5, %c0_6] : memref<2x8x32xbf16, #tpu.memory_space<vmem>>, vector<1x8x16xbf16>
    %15 = vector.shape_cast %14 : vector<1x8x16xbf16> to vector<8x16xbf16>
    %16 = arith.index_cast %c0_i32_2 : i32 to index
    %c0_7 = arith.constant 0 : index
    %c16 = arith.constant 16 : index
    %17 = vector.load %arg7[%16, %c0_7, %c16] : memref<2x8x32xbf16, #tpu.memory_space<vmem>>, vector<1x8x16xbf16>
    %18 = vector.shape_cast %17 : vector<1x8x16xbf16> to vector<8x16xbf16>
    %cst_8 = arith.constant dense<0.000000e+00> : vector<8x8xf32>
    %19 = tpu.matmul %12, %15, %cst_8 {dimension_numbers = #tpu.dot_dimension_numbers<[1], [1], [0], [0], [0, 0, 1, 0], [], []>} : vector<8x16xbf16>, vector<8x16xbf16>, vector<8x8xf32> -> vector<8x8xf32>
    %cst_9 = arith.constant dense<0xFF800000> : vector<8xf32>
    %20 = vector.multi_reduction <maximumf>, %19, %cst_9 [1] : vector<8x8xf32> to vector<8xf32>
    %21 = vector.shape_cast %20 : vector<8xf32> to vector<8x1xf32>
    %22 = vector.broadcast %21 : vector<8x1xf32> to vector<8x8xf32>
    %23 = arith.subf %19, %22 : vector<8x8xf32>
    %24 = math.exp %23 : vector<8x8xf32>
    %cst_10 = arith.constant dense<0.000000e+00> : vector<8xf32>
    %25 = vector.multi_reduction <add>, %24, %cst_10 [1] : vector<8x8xf32> to vector<8xf32>
    %26 = vector.shape_cast %25 : vector<8xf32> to vector<8x1xf32>
    %27 = arith.truncf %24 : vector<8x8xf32> to vector<8x8xbf16>
    %cst_11 = arith.constant dense<0.000000e+00> : vector<8x16xf32>
    %28 = tpu.matmul %27, %18, %cst_11 {dimension_numbers = #tpu.dot_dimension_numbers<[1], [0], [0], [1], [0, 0, 1, 1], [], []>} : vector<8x8xbf16>, vector<8x16xbf16>, vector<8x16xf32> -> vector<8x16xf32>
    %29 = tpu.reciprocal %26 {approx = true} : vector<8x1xf32> -> vector<8x1xf32>
    %30 = vector.broadcast %29 : vector<8x1xf32> to vector<8x16xf32>
    %31 = arith.mulf %28, %30 : vector<8x16xf32>
    %32 = arith.truncf %31 : vector<8x16xf32> to vector<8x16xbf16>
    %33 = arith.index_cast %c0_i32_2 : i32 to index
    %c0_12 = arith.constant 0 : index
    %c0_13 = arith.constant 0 : index
    %34 = vector.load %arg8[%33, %c0_12, %c0_13] : memref<2x8x16xbf16, #tpu.memory_space<vmem>>, vector<1x8x16xbf16>
    %35 = vector.shape_cast %34 : vector<1x8x16xbf16> to vector<8x16xbf16>
    %36 = vector.shape_cast %32 : vector<8x16xbf16> to vector<1x8x16xbf16>
    tpu.vector_store %arg8[%33, %c0_12, %c0_13], %36 {strides = array<i32>} : memref<2x8x16xbf16, #tpu.memory_space<vmem>>, vector<1x8x16xbf16>,
    %c1_i32 = arith.constant 1 : i32
    %37 = arith.index_cast %c1_i32 : i32 to index
    %c0_14 = arith.constant 0 : index
    %c0_15 = arith.constant 0 : index
    %38 = vector.load %arg3[%37, %c0_14, %c0_15] : memref<2x32x16xbf16, #tpu.memory_space<vmem>>, vector<1x32x16xbf16>
    %39 = vector.shape_cast %38 : vector<1x32x16xbf16> to vector<32x16xbf16>
    %cst_16 = arith.constant dense<0.000000e+00> : vector<8x16xf32>
    %40 = tpu.matmul %7, %39, %cst_16 {dimension_numbers = #tpu.dot_dimension_numbers<[1], [0], [0], [1], [0, 0, 1, 1], [], []>} : vector<8x32xbf16>, vector<32x16xbf16>, vector<8x16xf32> -> vector<8x16xf32>
    %41 = arith.truncf %40 : vector<8x16xf32> to vector<8x16xbf16>
    %42 = arith.index_cast %c1_i32 : i32 to index
    %c0_17 = arith.constant 0 : index
    %c0_18 = arith.constant 0 : index
    %43 = vector.load %arg7[%42, %c0_17, %c0_18] : memref<2x8x32xbf16, #tpu.memory_space<vmem>>, vector<1x8x16xbf16>
    %44 = vector.shape_cast %43 : vector<1x8x16xbf16> to vector<8x16xbf16>
    %45 = arith.index_cast %c1_i32 : i32 to index
    %c0_19 = arith.constant 0 : index
    %c16_20 = arith.constant 16 : index
    %46 = vector.load %arg7[%45, %c0_19, %c16_20] : memref<2x8x32xbf16, #tpu.memory_space<vmem>>, vector<1x8x16xbf16>
    %47 = vector.shape_cast %46 : vector<1x8x16xbf16> to vector<8x16xbf16>
    %cst_21 = arith.constant dense<0.000000e+00> : vector<8x8xf32>
    %48 = tpu.matmul %41, %44, %cst_21 {dimension_numbers = #tpu.dot_dimension_numbers<[1], [1], [0], [0], [0, 0, 1, 0], [], []>} : vector<8x16xbf16>, vector<8x16xbf16>, vector<8x8xf32> -> vector<8x8xf32>
    %cst_22 = arith.constant dense<0xFF800000> : vector<8xf32>
    %49 = vector.multi_reduction <maximumf>, %48, %cst_22 [1] : vector<8x8xf32> to vector<8xf32>
    %50 = vector.shape_cast %49 : vector<8xf32> to vector<8x1xf32>
    %51 = vector.broadcast %50 : vector<8x1xf32> to vector<8x8xf32>
    %52 = arith.subf %48, %51 : vector<8x8xf32>
    %53 = math.exp %52 : vector<8x8xf32>
    %cst_23 = arith.constant dense<0.000000e+00> : vector<8xf32>
    %54 = vector.multi_reduction <add>, %53, %cst_23 [1] : vector<8x8xf32> to vector<8xf32>
    %55 = vector.shape_cast %54 : vector<8xf32> to vector<8x1xf32>
    %56 = arith.truncf %53 : vector<8x8xf32> to vector<8x8xbf16>
    %cst_24 = arith.constant dense<0.000000e+00> : vector<8x16xf32>
    %57 = tpu.matmul %56, %47, %cst_24 {dimension_numbers = #tpu.dot_dimension_numbers<[1], [0], [0], [1], [0, 0, 1, 1], [], []>} : vector<8x8xbf16>, vector<8x16xbf16>, vector<8x16xf32> -> vector<8x16xf32>
    %58 = tpu.reciprocal %55 {approx = true} : vector<8x1xf32> -> vector<8x1xf32>
    %59 = vector.broadcast %58 : vector<8x1xf32> to vector<8x16xf32>
    %60 = arith.mulf %57, %59 : vector<8x16xf32>
    %61 = arith.truncf %60 : vector<8x16xf32> to vector<8x16xbf16>
    %62 = arith.index_cast %c1_i32 : i32 to index
    %c0_25 = arith.constant 0 : index
    %c0_26 = arith.constant 0 : index
    %63 = vector.load %arg8[%62, %c0_25, %c0_26] : memref<2x8x16xbf16, #tpu.memory_space<vmem>>, vector<1x8x16xbf16>
    %64 = vector.shape_cast %63 : vector<1x8x16xbf16> to vector<8x16xbf16>
    %65 = vector.shape_cast %61 : vector<8x16xbf16> to vector<1x8x16xbf16>
    tpu.vector_store %arg8[%62, %c0_25, %c0_26], %65 {strides = array<i32>} : memref<2x8x16xbf16, #tpu.memory_space<vmem>>, vector<1x8x16xbf16>,
    %c2_i32 = arith.constant 2 : i32
    %c0_27 = arith.constant 0 : index
    %c0_28 = arith.constant 0 : index
    %c0_29 = arith.constant 0 : index
    %66 = vector.load %arg8[%c0_27, %c0_28, %c0_29] : memref<2x8x16xbf16, #tpu.memory_space<vmem>>, vector<1x8x16xbf16>
    %67 = vector.shape_cast %66 : vector<1x8x16xbf16> to vector<8x16xbf16>
    %c0_30 = arith.constant 0 : index
    %c0_31 = arith.constant 0 : index
    %c0_32 = arith.constant 0 : index
    %68 = vector.load %arg5[%c0_30, %c0_31, %c0_32] : memref<1x8x32xbf16, #tpu.memory_space<vmem>>, vector<1x8x16xbf16>
    %69 = vector.shape_cast %68 : vector<1x8x16xbf16> to vector<8x16xbf16>
    %70 = vector.shape_cast %67 : vector<8x16xbf16> to vector<1x8x16xbf16>
    tpu.vector_store %arg5[%c0_30, %c0_31, %c0_32], %70 {strides = array<i32>} : memref<1x8x32xbf16, #tpu.memory_space<vmem>>, vector<1x8x16xbf16>,
    %c1 = arith.constant 1 : index
    %c0_33 = arith.constant 0 : index
    %c0_34 = arith.constant 0 : index
    %71 = vector.load %arg8[%c1, %c0_33, %c0_34] : memref<2x8x16xbf16, #tpu.memory_space<vmem>>, vector<1x8x16xbf16>
    %72 = vector.shape_cast %71 : vector<1x8x16xbf16> to vector<8x16xbf16>
    %c0_35 = arith.constant 0 : index
    %c0_36 = arith.constant 0 : index
    %c16_37 = arith.constant 16 : index
    %73 = vector.load %arg5[%c0_35, %c0_36, %c16_37] : memref<1x8x32xbf16, #tpu.memory_space<vmem>>, vector<1x8x16xbf16>
    %74 = vector.shape_cast %73 : vector<1x8x16xbf16> to vector<8x16xbf16>
    %75 = vector.shape_cast %72 : vector<8x16xbf16> to vector<1x8x16xbf16>
    tpu.vector_store %arg5[%c0_35, %c0_36, %c16_37], %75 {strides = array<i32>} : memref<1x8x32xbf16, #tpu.memory_space<vmem>>, vector<1x8x16xbf16>,
    return
  }
  func.func @transform_0(%arg0: i32, %arg1: i32) -> (i32, i32, i32) {
    %c0_i32 = arith.constant 0 : i32
    %c0_i32_0 = arith.constant 0 : i32
    %c0_i32_1 = arith.constant 0 : i32
    return %arg0, %c0_i32, %c0_i32_0 : i32, i32, i32
  }
  func.func @transform_1(%arg0: i32, %arg1: i32) -> (i32, i32, i32) {
    %c0_i32 = arith.constant 0 : i32
    %c0_i32_0 = arith.constant 0 : i32
    %c0_i32_1 = arith.constant 0 : i32
    %c0_i32_2 = arith.constant 0 : i32
    return %c0_i32, %c0_i32_0, %c0_i32_1 : i32, i32, i32
  }
  func.func @transform_2(%arg0: i32, %arg1: i32) -> (i32, i32, i32) {
    %c0_i32 = arith.constant 0 : i32
    %c0_i32_0 = arith.constant 0 : i32
    %c0_i32_1 = arith.constant 0 : i32
    %c0_i32_2 = arith.constant 0 : i32
    return %c0_i32, %c0_i32_0, %c0_i32_1 : i32, i32, i32
  }
  func.func @transform_3(%arg0: i32, %arg1: i32) -> (i32, i32, i32) {
    %c0_i32 = arith.constant 0 : i32
    %c0_i32_0 = arith.constant 0 : i32
    return %arg0, %arg1, %c0_i32 : i32, i32, i32
  }
  func.func @transform_4(%arg0: i32, %arg1: i32) -> (i32, i32, i32) {
    %c0_i32 = arith.constant 0 : i32
    %c0_i32_0 = arith.constant 0 : i32
    %c0_i32_1 = arith.constant 0 : i32
    return %arg0, %c0_i32, %c0_i32_0 : i32, i32, i32
  }
}

</mosaic_0001>

<bundles_post_ra>
// kernel: full_attention.1
= control target key start
LH: loop header
LB: loop body
LE: loop exit
PB: predicated region body
PF: predicated region fallthrough
CT: control target
= control target key end

     0   :  { %10 = vsyncpa [#allocation6], 0  ;;  %s1374_s0 = inlined_call_operand.vmem [shape: bf16[2,8,32], index: 0, kind: input, shape index: {}]   ;;  %s1375_s1 = inlined_call_operand.vmem [shape: bf16[2,32,16], index: 1, kind: input, shape index: {}]   ;;  %s1376_s2 = inlined_call_operand.vmem [shape: bf16[2,32,32], index: 2, kind: input, shape index: {}]   ;;  %s1377_s3 = inlined_call_operand.hbm [shape: bf16[2,8,32], index: 3, kind: output, shape index: {0}]   ;;  %s1378_s4 = inlined_call_operand.hbm [shape: bf16[2,8,16], index: 4, kind: output, shape index: {1}]  }
   0x1   :  { %12 = vsyncpa [#allocation6 + $0x1], 0 }
   0x2   :  { %13 = vsyncpa [#allocation8], 0 }
   0x3   :  { %15 = vsyncpa [#allocation8 + $0x1], 0  ;;  %s1157_s15 = smov 0   ;;  %s1159_s16 = smov 0  }
   0x4   :  { %s1161_s17 = smov 0   ;;  %s1163_s18 = smov 0  }
   0x5   :  { %s1165_s19 = smov 0   ;;  %s1167_s20 = smov 0  }
   0x6 LB: > { %s817_s21 = sadd.s32 4294967295, %s1118_s20   ;;  %s818_s22 = sadd.s32 4294967294, %s1118_s20   ;;  %s1118_s20 = sphi %s1167_s20, %s21_s20   ;;  %s1114_s19 = sphi %s1165_s19, %s1385_s19   ;;  %s1110_s18 = sphi %s1163_s18, %s1384_s18   ;;  %s1106_s17 = sphi %s1161_s17, %s1383_s17   ;;  %s1102_s16 = sphi %s1159_s16, %s1382_s16   ;;  %s1098_s15 = sphi %s1157_s15, %s1381_s15  }
   0x7   : > { %s33_s23 = sadd.s32 1, %s1114_s19  ;;  %s110_s24 = sadd.s32 1, %s1106_s17 }
   0x8   : > { %p35_p0 = scmp.ge.s32.totalorder %s33_s23, 2  ;;  %p120_p1 = scmp.ne.s32.totalorder %s1106_s17, %s1102_s16 }
   0x9   : > { %p121_p2 = scmp.eq.s32.totalorder %s817_s21, 1  ;;  %p126_p3 = scmp.ne.s32.totalorder %s1102_s16, %s1098_s15 }
   0xa   : > { %s1387_s23 = smov (%p35_p0, %s33_s23), 0  ;;  %p127_p5 = scmp.eq.s32.totalorder %s818_s22, 1 }
   0xb   : > { %p1197_p4 = por %p121_p2, %p120_p1  ;;  %s105_s26 = ssub.s32 %s1114_s19, %s1387_s23 }
   0xc   : > { %p821_p6 = scmp.ge.s32.totalorder %s1118_s20, 1  ;;  %p108_p7 = scmp.eq.s32.totalorder %s105_s26, 0 }
   0xd   : > { %p1204_p8 = por %p127_p5, %p126_p3  ;;  %p184_p9 = scmp.lt.s32.totalorder %s1118_s20, 3 }
   0xe   : > { %s1210_s28 = scalar_select %p108_p7, %s1106_s17, %s110_s24  }
   0xf   : > { %p185_p10 = pnand %p821_p6, %p184_p9 }
  0x10   : > { %s1213_s29 = sand.u32 (!%p185_p10), 1, %s1102_s16   ;;  %p214_p11 = scmp.lt.s32.totalorder (!%p185_p10), %s1110_s18, 1 }
  0x11   : > { %188 = sbr.rel (%p185_p10) target bundleno = 1304 (0x518), region = 32  ;;  %s822_s30 = sshll.u32 (!%p185_p10), %s1213_s29, 2 }
  0x12   : > { %s1226_s10 = scalar_lea.vmem (!%p185_p10), [#allocation5], %s822_s30  ;;  %s1228_s11 = scalar_lea.vmem (!%p185_p10), [#allocation7], %s822_s30 }
  0x13   : > { %s1230_s12 = smov (!%p185_p10), 0  }
  0x16   : > { %vm224_vm0 = vcmask 130048   ;;  %v1124_v0 = vmov 0.0   ;;  %s215_s5 = scalar_select %p214_p11, %s1110_s18, 1 }
  0x17   : > { %225 = vst.msk [vmem:[#allocation4] sm:$0xff] %vm224_vm0, %v1124_v0 }
  0x18   : > { %s824_s6 = sshll.u32 %s215_s5, 2 }
  0x19   : > { %s1223_s9 = scalar_lea.vmem %s1374_s0, %s824_s6 }
  0x1a   : > { %v223_v1 = vld [vmem:[%s1223_s9] sm:$0xf] }
  0x1b LB: >> { %v1125_v2 = vmov 0.0   ;;  %vm1126_vm1 = vmmov 0   ;;  %s853_s13 = sshll.u32 %s1122_s12, 4  ;;  %vm251_vm2 = vcmask 261120   ;;  %s830_s24 = sshll.u32 %s1122_s12, 2  ;;  %vm298_vm3 = vcmask 257024   ;;  %s1122_s12 = sphi %s1230_s12, %s231_s12  }
  0x1c   : >> { %871 = vmatprep.subr.bf16.mxu0 %v1125_v2  ;;  %875 = vmatprep.mubr.msk.bf16.mxu0 %vm1126_vm1, %v1125_v2  ;;  %s234_s22 = scalar_lea.vmem %s1376_s2, %s853_s13  ;;  %s297_s26 = scalar_lea.vmem [#allocation2], %s830_s24 }
  0x1d   : >> { %v993_v3 = vld [vmem:[%s234_s22 + $0x8] sm:$0xff]   ;;  %v994_v4 = vld [vmem:[%s234_s22] sm:$0xff]   ;;  %s231_s12 = sadd.s32 1, %s1122_s12  }
  0x1e   : >> { %872 = vmatpush3.bf16.msra.mxu0 %v993_v3  ;;  %v300_v7 = vld [vmem:[#allocation4] sm:$0xff]  ;;  %p228_p12 = scmp.ge.s32.totalorder %s231_s12, 2  }
  0x1f   : >> { %873 = vmatprep.subr.bf16.mxu0 %v1125_v2  ;;  %v995_v13 = vld [vmem:[%s1375_s1 + $0x8] sm:$0xff] (%p228_p12)   ;;  %887 = vmatprep.subr.bf16.mxu1 (%p228_p12), %v1124_v0  ;;  %vm1127_vm4 = vmmov (%p228_p12), 0   ;;  %v996_v14 = vld [vmem:[%s1375_s1] sm:$0xff] (%p228_p12)   ;;  %v998_v19 = vld [vmem:[%s1375_s1 + $0x18] sm:$0xff] (%p228_p12)   ;;  %vm424_vm5 = vcmask (%p228_p12), 64512   ;;  %s1128_s14 = smov (%p228_p12), 112  }
  0x20   : > { %889 = vmatprep.mubr.msk.bf16.mxu1 (%p228_p12), %vm1127_vm4, %v1124_v0  ;;  %v314_v17 = vld [vmem:[%s1223_s9] sm:$0xf] (%p228_p12)  ;;  %v999_v23 = vld [vmem:[%s1375_s1 + $0x10] sm:$0xff] (%p228_p12)   ;;  %vm443_vm6 = vcmask (%p228_p12), 1043456   ;;  %vm307_vm7 = vcmask (%p228_p12), 125952   ;;  %s849_s21 = sshll.u32 (%p228_p12), %s1110_s18, 6 }
  0x21   : > { %s706_s30 = sshll.u32 (%p228_p12), %s1228_s11, 4  ;;  %s679_s5 = scalar_lea.sflag (%p228_p12), [#allocation8], %s1213_s29  ;;  %s707_s30 = int_to_ptr.vmem [resolvable:$true] %s706_s30 }
  0x22   : >> { %874 = vmatpush3.bf16.msra.mxu0 %v994_v4  ;;  %s1008_s6 = scalar_lea.vmem (%p228_p12), %s707_s30, 64  ;;  %s1129_s7 = smov (%p228_p12), [#allocation7]  }
  0x23   : > { %879 = vmatprep.subr.bf16.mxu0 (%p228_p12), %v1124_v0  ;;  %p1009_p13 = scmp.ne.s32.totalorder (%p228_p12), %s707_s30, %s1008_s6  ;;  %s1012_s8 = sshll.u32 (%p228_p12), %s1129_s7, 4  ;;  %s1013_s8 = int_to_ptr.vmem [resolvable:$false] %s1012_s8 }
  0x24   : > { %s1014_s12 = scalar_lea.vmem (%p228_p12), %s1013_s8, 128  ;;  %p1015_p2 = scmp.lt.s32.totalorder (%p228_p12), %s707_s30, %s1013_s8 }
  0x25   : >> { %876 = vmatmul.mubr.msk.bf16.vlgmr.msra.gmra.mxu0 %vm251_vm2, %v223_v1  ;;  %p1010_p0 = pnand (%p228_p12), %p1009_p13, %p1197_p4  ;;  %p1016_p3 = scmp.lt.s32.totalorder (%p228_p12), %s1014_s12, %s1008_s6 }
  0x26   : > { %883 = vmatprep.mubr.msk.bf16.mxu0 (%p228_p12), %vm1127_vm4, %v1124_v0  ;;  %880 = vmatpush3.bf16.msra.mxu0 (%p228_p12), %v995_v13 }
  0x27   : > { %881 = vmatprep.subr.bf16.mxu0 (%p228_p12), %v1124_v0  ;;  %p1011_p1 = pneg (%p228_p12), %p1010_p0  ;;  %p1017_p5 = por (%p228_p12), %p1016_p3, %p1015_p2 }
  0x29   : > { %p1018_p6 = pnand (%p228_p12), %p1017_p5, %p1011_p1 }
  0x2a   : > { %882 = vmatpush3.bf16.msra.mxu0 (%p228_p12), %v996_v14 }
  0x2b   : > { %893 = vmatprep.subr.bf16.mxu0 (%p228_p12), %v1124_v0 }
  0x2d   : > { %884 = vmatmul.mubr.msk.bf16.vlgmr.msra.gmra.mxu0 (%p228_p12), %vm251_vm2, %v314_v17 }
  0x2e   : > { %895 = vmatprep.mubr.msk.bf16.mxu0 (%p228_p12), %vm1127_vm4, %v1124_v0 }
  0xe5   : >> { %v289_v5 = vpop.f32.mrf.mxu0 }
  0xe6   : >> { %v295_v6 = vpack.c.bf16 %v289_v5, %v289_v5 }
  0xe7   : >> { %v877_v8 = vpop.f32.mrf.mxu0 }
  0xe8   : >> { %299 = vst.msk [vmem:[%s297_s26] sm:$0xf] %vm298_vm3, %v295_v6  ;;  %v301_v9 = vunpack.c.l.bf16 %v295_v6  ;;  %230 = sbr.rel (!%p228_p12) target bundleno = 27 (0x1b), region = 101  ;;  %s1305_s26 = scalar_lea.hbm (%p228_p12), %s1378_s4, %s849_s21 }
  0xe9   : >> { %v292_v10 = vpop.f32.mrf.mxu0 }
  0xea   : >> { %v302_v11 = vadd.f32 %v301_v9, %v300_v7 }
  0xeb   : >> { %v878_v12 = vpop.f32.mrf.mxu0 }
  0xec   : >> { %303 = vst.msk [vmem:[#allocation4] sm:$0xff] %vm224_vm0, %v302_v11 }
  0xed   : > { %v369_v18 = vpop.f32.mrf.mxu0 }
  0xee   : > { %v375_v20 = vpack.c.bf16 %v369_v18, %v369_v18 }
  0xef   : > { %v376_v15 = vld [vmem:[#allocation2] sm:$0xf]  ;;  %v885_v21 = vpop.f32.mrf.mxu0  ;;  %v551_v40 = vld [vmem:[#allocation2 + $0x4] sm:$0xf] }
  0xf0   : > { %v382_v16 = vsel %vm224_vm0, %v376_v15, 0  ;;  %v835_v30 = vcombine.low %v376_v15, %v376_v15  ;;  %v556_v44 = vsel %vm224_vm0, %v551_v40, 0  ;;  %v845_v60 = vcombine.low %v551_v40, %v551_v40 }
  0xf1   : > { %888 = vmatpush3.bf16.xpose.msra.mxu1 %v382_v16  ;;  %v372_v22 = vpop.f32.mrf.mxu0 }
  0xf2   : > { %899 = vmatprep.subr.bf16.mxu1 %v1124_v0 }
  0xf3   : > { %v886_v24 = vpop.f32.mrf.mxu0  ;;  %v304_v6 = vld [vmem:[#allocation4] sm:$0xff] }
  0xf4   : > { %v305_v7 = vmul.f32 0.5, %v304_v6 }
  0xf6   : > { %v306_v8 = vpack.c.bf16 %v305_v7, %v305_v7 }
  0xf8   : > { %890 = vmatmul.mubr.msk.bf16.vlgmr.msra.gmra.mxu1 %vm224_vm0, %v375_v20  ;;  %308 = vst.msk [vmem:[%s1228_s11] sm:$0xf] %vm307_vm7, %v306_v8 }
  0xf9   : > { %900 = vmatpush3.bf16.msra.mxu1 %v998_v19  ;;  %903 = vmatprep.mubr.msk.bf16.mxu1 %vm1127_vm4, %v1124_v0 }
  0xfa   : > { %901 = vmatprep.subr.bf16.mxu1 %v1124_v0 }
  0xfd   : > { %902 = vmatpush3.bf16.msra.mxu1 %v999_v23 }
  0xfe   : > { %913 = vmatprep.subr.bf16.mxu1 %v1124_v0 }
 0x100   : > { %904 = vmatmul.mubr.msk.bf16.vlgmr.msra.gmra.mxu1 %vm251_vm2, %v314_v17 }
 0x101   : > { %915 = vmatprep.mubr.msk.bf16.mxu1 %vm1127_vm4, %v1124_v0 }
 0x1b8   : > { %v418_v25 = vpop.f32.mrf.mxu1 }
 0x1b9   : > { %v425_v26 = vsel %vm424_vm5, %v418_v25, -inf }
 0x1ba   : > { %426 = vmax.xlane.f32.xlu0 %v425_v26  ;;  %v891_v27 = vpop.f32.mrf.mxu1 }
 0x1bc   : > { %v421_v28 = vpop.f32.mrf.mxu1 }
 0x1be   : > { %v892_v29 = vpop.f32.mrf.mxu1 }
 0x1c0   : > { %v543_v31 = vpop.f32.mrf.mxu1 }
 0x1c1   : > { %v549_v45 = vpack.c.bf16 %v543_v31, %v543_v31 }
 0x1c2   : > { %v905_v32 = vpop.f32.mrf.mxu1 }
 0x1c4   : > { %v546_v33 = vpop.f32.mrf.mxu1 }
 0x1c6   : > { %v906_v34 = vpop.f32.mrf.mxu1 }
 0x1d0   : > { %438 = vrot.lane.b32.xlu0 %v835_v30, %s1128_s14 }
 0x243   : > { %v427_v35 = vpop.xlane.xlu0 %426 }
 0x244   : > { %v428_v36 = vsub.f32 %v418_v25, %v427_v35 }
 0x246   : > { %v429_v37 = vmul.f32 1.442695, %v428_v36 }
 0x247   : > { %v439_v38 = vpop.permute.xlu0 %438 }
 0x248   : > { %1000 = vpow2.f32 %v429_v37  ;;  %v445_v39 = vsel %vm443_vm6, %v439_v38, 0 }
 0x249   : > { %894 = vmatpush3.bf16.msra.mxu0 %v445_v39 }
 0x24a   : > { %907 = vmatprep.subr.bf16.mxu0 %v1124_v0 }
 0x255   : > { %v1001_v41 = vpop.eup %1000 }
 0x256   : > { %v431_v42 = vsel %vm424_vm5, %v1001_v41, 0.0  ;;  %v434_v43 = vpack.c.bf16 %v1001_v41, %v1001_v41 }
 0x257   : > { %432 = vadd.xlane.f32.xlu0 %v431_v42 }
 0x258   : > { %896 = vmatmul.mubr.msk.bf16.vlgmr.msra.gmra.mxu0 %vm424_vm5, %v434_v43 }
 0x259   : > { %908 = vmatpush3.bf16.xpose.msra.mxu0 %v556_v44  ;;  %909 = vmatprep.mubr.msk.bf16.mxu0 %vm1127_vm4, %v1124_v0 }
 0x260   : > { %910 = vmatmul.mubr.msk.bf16.vlgmr.msra.gmra.mxu0 %vm224_vm0, %v549_v45 }
 0x2e0   : > { %v433_v46 = vpop.xlane.xlu0 %432 }
 0x2e1   : > { %1002 = vrcp.f32 %v433_v46 }
 0x2ee   : > { %v1003_v47 = vpop.eup %1002 }
 0x318   : > { %v481_v48 = vpop.f32.mrf.mxu0 }
 0x319   : > { %v488_v49 = vmul.f32 %v1003_v47, %v481_v48 }
 0x31a   : > { %v897_v50 = vpop.f32.mrf.mxu0 }
 0x31b   : > { %v489_v51 = vpack.c.bf16 %v488_v49, %v488_v49 }
 0x31c   : > { %v484_v52 = vpop.f32.mrf.mxu0 }
 0x31d   : > { %491 = vst.msk [vmem:[#allocation3] sm:$0xf] %vm307_vm7, %v489_v51 }
 0x31e   : > { %v898_v53 = vpop.f32.mrf.mxu0 }
 0x320   : > { %v592_v54 = vpop.f32.mrf.mxu0 }
 0x321   : > { %v598_v55 = vsel %vm424_vm5, %v592_v54, -inf }
 0x322   : > { %599 = vmax.xlane.f32.xlu1 %v598_v55  ;;  %v911_v56 = vpop.f32.mrf.mxu0 }
 0x324   : > { %v595_v57 = vpop.f32.mrf.mxu0  ;;  %v664_v58 = vld [vmem:[#allocation3] sm:$0xf] }
 0x325   : > { %665 = vst.msk [vmem:[%s1226_s10] sm:$0xf] %vm307_vm7, %v664_v58 }
 0x326   : > { %v912_v59 = vpop.f32.mrf.mxu0 }
 0x333   : > { %611 = vrot.lane.b32.xlu1 %v845_v60, %s1128_s14 }
 0x3ab   : > { %v600_v61 = vpop.xlane.xlu1 %599 }
 0x3ac   : > { %v601_v62 = vsub.f32 %v592_v54, %v600_v61 }
 0x3ae   : > { %v602_v63 = vmul.f32 1.442695, %v601_v62 }
 0x3af   : > { %v612_v0 = vpop.permute.xlu1 %611 }
 0x3b0   : > { %1004 = vpow2.f32 %v602_v63  ;;  %v617_v1 = vsel %vm443_vm6, %v612_v0, 0 }
 0x3b1   : > { %914 = vmatpush3.bf16.msra.mxu1 %v617_v1 }
 0x3bd   : > { %v1005_v2 = vpop.eup %1004 }
 0x3be   : > { %v604_v3 = vsel %vm424_vm5, %v1005_v2, 0.0  ;;  %v607_v4 = vpack.c.bf16 %v1005_v2, %v1005_v2 }
 0x3bf   : > { %605 = vadd.xlane.f32.xlu1 %v604_v3 }
 0x3c0   : > { %916 = vmatmul.mubr.msk.bf16.vlgmr.msra.gmra.mxu1 %vm424_vm5, %v607_v4 }
 0x448   : > { %v606_v5 = vpop.xlane.xlu1 %605 }
 0x449   : > { %1006 = vrcp.f32 %v606_v5 }
 0x456   : > { %v1007_v9 = vpop.eup %1006 }
 0x480   : > { %v653_v10 = vpop.f32.mrf.mxu1 }
 0x481   : > { %v660_v11 = vmul.f32 %v1007_v9, %v653_v10 }
 0x482   : > { %v917_v12 = vpop.f32.mrf.mxu1 }
 0x483   : > { %v661_v13 = vpack.c.bf16 %v660_v11, %v660_v11 }
 0x484   : > { %v656_v14 = vpop.f32.mrf.mxu1 }
 0x485   : > { %1021 = shalt.err (!%p1018_p6)
}
 0x486   : > { %s1022_s11 = scalar_lea.hbm %s1305_s26, 64  ;;  %s1026_s14 = scalar_lea.hbm %s1378_s4, 128 }
 0x487   : > { %p1023_p7 = scmp.ne.s32.totalorder %s1305_s26, %s1022_s11  ;;  %p1027_p11 = scmp.lt.s32.totalorder %s1305_s26, %s1378_s4 }
 0x488   : > { %p1028_p12 = scmp.lt.s32.totalorder %s1026_s14, %s1022_s11 }
 0x489   : > { %p1024_p9 = pnand %p1023_p7, %p1197_p4 }
 0x48a   : > { %p1029_p13 = por %p1028_p12, %p1027_p11 }
 0x48b   : > { %p1025_p10 = pneg %p1024_p9 }
 0x48d   : > { %p1030_p0 = pnand %p1029_p13, %p1025_p10 }
 0x48f   : > { %1033 = shalt.err (!%p1030_p0)
}
 0x490   : > { %920 = dma.vmem_to_hbm [thread:$0]  (%p1197_p4), %s707_s30, 64, %s1305_s26, %s679_s5   ;;  %663 = vst.msk [vmem:[#allocation3 + $0x4] sm:$0xf] %vm307_vm7, %v661_v13  ;;  %v918_v15 = vpop.f32.mrf.mxu1  ;;  %vm671_vm8 = vcmask 257152  }
 0x491   : > { %s1130_s6 = smov 16   ;;  %s693_s7 = sshll.u32 %s1226_s10, 4  ;;  %s694_s7 = int_to_ptr.vmem [resolvable:$true] %s693_s7 }
 0x492   : > { %s1332_s11 = scalar_lea.hbm %s1377_s3, %s849_s21  ;;  %s674_s13 = scalar_lea.sflag [#allocation6], %s1213_s29 }
 0x493   : > { %s1034_s9 = scalar_lea.vmem %s694_s7, 64  ;;  %s1131_s26 = smov [#allocation5]  }
 0x494   : > { %p1035_p1 = scmp.ne.s32.totalorder %s694_s7, %s1034_s9  ;;  %s1038_s30 = sshll.u32 %s1131_s26, 4  ;;  %s1039_s30 = int_to_ptr.vmem [resolvable:$false] %s1038_s30 }
 0x495   : > { %s1040_s5 = scalar_lea.vmem %s1039_s30, 128  ;;  %p1041_p5 = scmp.lt.s32.totalorder %s694_s7, %s1039_s30 }
 0x496   : > { %p1036_p2 = pnand %p1035_p1, %p1197_p4  ;;  %p1042_p6 = scmp.lt.s32.totalorder %s1040_s5, %s1034_s9 }
 0x497   : > { %v666_v16 = vld [vmem:[#allocation3 + $0x4] sm:$0xf] }
 0x498   : > { %668 = vrot.lane.b32.xlu0 %v666_v16, %s1130_s6  ;;  %p1037_p3 = pneg %p1036_p2  ;;  %p1043_p7 = por %p1042_p6, %p1041_p5 }
 0x49a   : > { %p1044_p9 = pnand %p1043_p7, %p1037_p3 }
 0x50a   : > { %v669_v17 = vpop.permute.xlu0 %668 }
 0x50b   : > { %672 = vst.msk [vmem:[%s1226_s10] sm:$0xf] %vm671_vm8, %v669_v17 }
 0x50c   : > { %1047 = shalt.err (!%p1044_p9)
}
 0x50d   : > { %s1048_s18 = scalar_lea.hbm %s1332_s11, 64  ;;  %s1052_s21 = scalar_lea.hbm %s1377_s3, 128 }
 0x50e   : > { %p1049_p10 = scmp.ne.s32.totalorder %s1332_s11, %s1048_s18  ;;  %p1053_p13 = scmp.lt.s32.totalorder %s1332_s11, %s1377_s3 }
 0x50f   : > { %p1054_p0 = scmp.lt.s32.totalorder %s1052_s21, %s1048_s18 }
 0x510   : > { %p1050_p11 = pnand %p1049_p10, %p1197_p4 }
 0x511   : > { %p1055_p1 = por %p1054_p0, %p1053_p13 }
 0x512   : > { %p1051_p12 = pneg %p1050_p11 }
 0x514   : > { %p1056_p2 = pnand %p1055_p1, %p1051_p12 }
 0x516   : > { %1059 = shalt.err (!%p1056_p2)
}
 0x517   : > { %919 = dma.vmem_to_hbm [thread:$0]  (%p1197_p4), %s694_s7, 64, %s1332_s11, %s674_s13  }
 0x518 PF: > { %p930_p3 = scmp.ge.s32.totalorder %s1118_s20, 2  ;;  %s718_s24 = sand.u32 1, %s1098_s15  }
 0x519   : > { %s719_s6 = scalar_lea.sflag [#allocation6], %s718_s24 }
 0x51a   : > { %p924_p5 = pnand %p930_p3, %p1204_p8 }
 0x51c   : > { %p925_p6 = pneg %p924_p5 }
 0x51e   : > { %1089 = dma.done.wait (%p925_p6), %s719_s6, 64  }
 0x51f   : > { %1091 = vsyncadd (%p925_p6), %s719_s6, 4294967232  ;;  %s728_s8 = scalar_lea.sflag [#allocation8], %s718_s24 }
 0x520   : > { %1093 = dma.done.wait (%p925_p6), %s728_s8, 64  }
 0x521   : > { %1095 = vsyncadd (%p925_p6), %s728_s8, 4294967232  ;;  %s21_s20 = sadd.s32 1, %s1118_s20   ;;  %s1381_s15 = smov %s1102_s16 }
 0x522   : > { %p18_p7 = scmp.ge.s32.totalorder %s21_s20, 4   ;;  %s1382_s16 = smov %s1106_s17 }
 0x523   : > { %s1383_s17 = smov %s1210_s28  ;;  %s1384_s18 = smov %s1114_s19 }
 0x524   : > { %s1385_s19 = smov %s1387_s23  ;;  %20 = sbr.rel (!%p18_p7) target bundleno = 6 (0x6), region = 112 }
 0x529   :  { %733 = vsyncpa [#allocation6], 1 }
 0x52a   :  { %735 = vsyncpa [#allocation6 + $0x1], 1 }
 0x52b   :  { %736 = vsyncpa [#allocation8], 1 }
 0x52c   :  { %738 = vsyncpa [#allocation8 + $0x1], 1 }

</bundles_post_ra>
